<compile_context>
chip_gen: v5e
topology: v5e:2x2
jax: 0.10.0
libtpu: 0.0.40
codegen_flags: <defaults>
</compile_context>

<pallas_src>
import functools

import jax
import jax.numpy as jnp
from jax.experimental import pallas as pl
from jax.experimental.pallas import tpu as pltpu

EPS = 1e-5


def _round_up(x, m):
    return ((x + m - 1) // m) * m


def _make_conv_relu_stats_kernel(k, cout, wp, w_out, h_out, hw_pad):
    """Conv(kxk, stride 1) + bias + ReLU + per-image BN partial stats."""

    def kernel(x_ref, w_ref, b_ref, y_ref, stats_ref):
        # x_ref:    (1, Cin, L)       padded image, flattened as q = h*Wp + w
        # w_ref:    (k*k, Cout, Cin)  resident (constant index_map)
        # b_ref:    (Cout, 1)         resident
        # y_ref:    (1, Cout, HW_pad) pixels on the 128-aligned lane axis
        # stats_ref:(1, Cout, 2)      [sum, sum_sq] over this image's valid pixels
        x = x_ref[0]                                    # (Cin, L), loaded once
        acc = jnp.zeros((cout, hw_pad), jnp.float32)
        for kh in range(k):                             # statically unrolled taps
            for kw in range(k):
                off = kh * wp + kw                      # uniform (static) lane shift
                xs = x[:, off:off + hw_pad]             # (Cin, HW_pad)
                acc = acc + jnp.dot(w_ref[kh * k + kw], xs,
                                    preferred_element_type=jnp.float32)
        y = jnp.maximum(acc + b_ref[...], 0.0)          # bias + ReLU
        y_ref[0] = y

        # Exclude the per-row width-padding lanes and the 128-round-up tail
        # from the batch statistics.
        q = jax.lax.broadcasted_iota(jnp.int32, (1, hw_pad), 1)
        valid = jnp.logical_and((q % wp) < w_out, q < h_out * wp)
        ym = jnp.where(valid, y, 0.0)
        s1 = jnp.sum(ym, axis=1, keepdims=True)         # (Cout, 1)
        s2 = jnp.sum(ym * ym, axis=1, keepdims=True)    # (Cout, 1)
        stats_ref[0] = jnp.concatenate([s1, s2], axis=1)

    return kernel


def _bn_apply_kernel(y_ref, scale_ref, shift_ref, o_ref):
    # out = y * (gamma * inv_std) + (beta - mean * gamma * inv_std)
    o_ref[0] = y_ref[0] * scale_ref[...] + shift_ref[...]


@functools.partial(jax.jit, static_argnames=("k", "pad"))
def conv_block_forward(x_nchw, conv_w, conv_b, bn_gamma, bn_beta, k=3, pad=1):
    N, Cin, H, W = x_nchw.shape
    Cout = conv_w.shape[0]
    Hp, Wp = H + 2 * pad, W + 2 * pad
    H_out = H + 2 * pad - k + 1
    W_out = W + 2 * pad - k + 1
    HW = H_out * Wp                        # output pixels on the padded-width grid
    HW_pad = _round_up(HW, 128)            # lane-dense output tiles
    L = (k - 1) * Wp + (k - 1) + HW_pad    # flat length covering every tap shift

    # ---- glue: ONE pad op does spatial padding AND the flat-length round-up
    # (extra zero rows at the bottom), then a free contiguous reshape flattens
    # (H, W) onto the lane axis.  No im2col, no second HBM copy.
    total_rows = max(Hp, pl.cdiv(L, Wp))
    L_block = total_rows * Wp              # >= L, covers every tap's slice
    xp = jnp.pad(x_nchw.astype(jnp.float32),
                 ((0, 0), (0, 0), (pad, pad + (total_rows - Hp)), (pad, pad)))
    x_flat = xp.reshape(N, Cin, L_block)

    # (Cout, Cin, kh, kw) -> (k*k, Cout, Cin); tap index = kh*k + kw
    w_taps = jnp.transpose(conv_w, (2, 3, 0, 1)).reshape(k * k, Cout, Cin)
    w_taps = w_taps.astype(jnp.float32)
    b_col = conv_b.reshape(Cout, 1).astype(jnp.float32)

    kernel1 = _make_conv_relu_stats_kernel(k, Cout, Wp, W_out, H_out, HW_pad)

    y, stats = pl.pallas_call(
        kernel1,
        out_shape=(jax.ShapeDtypeStruct((N, Cout, HW_pad), jnp.float32),
                   jax.ShapeDtypeStruct((N, Cout, 2), jnp.float32)),
        grid=(N,),
        in_specs=[
            pl.BlockSpec((1, Cin, L_block), lambda n: (n, 0, 0)),   # streamed per image
            pl.BlockSpec((k * k, Cout, Cin), lambda n: (0, 0, 0)),  # resident weights
            pl.BlockSpec((Cout, 1), lambda n: (0, 0)),              # resident bias
        ],
        out_specs=(
            pl.BlockSpec((1, Cout, HW_pad), lambda n: (n, 0, 0)),   # conv+relu result
            pl.BlockSpec((1, Cout, 2), lambda n: (n, 0, 0)),        # partial BN stats
        ),
        compiler_params=pltpu.CompilerParams(
            dimension_semantics=("parallel",)),
    )(x_flat, w_taps, b_col)

    # ---- BN finalize: tiny per-channel math, computed exactly once ----
    m = N * H_out * W_out
    total = jnp.sum(stats, axis=0)                                  # (Cout, 2)
    mean = total[:, 0] / m
    var = jnp.maximum(total[:, 1] / m - mean * mean, 0.0)           # biased var (PyTorch BN)
    inv = jax.lax.rsqrt(var + EPS)
    scale = (bn_gamma * inv).reshape(Cout, 1).astype(jnp.float32)
    shift = (bn_beta - mean * bn_gamma * inv).reshape(Cout, 1).astype(jnp.float32)

    # ---- pass 2: stream y back and apply the affine normalization in place ----
    out = pl.pallas_call(
        _bn_apply_kernel,
        out_shape=jax.ShapeDtypeStruct((N, Cout, HW_pad), jnp.float32),
        grid=(N,),
        in_specs=[
            pl.BlockSpec((1, Cout, HW_pad), lambda n: (n, 0, 0)),
            pl.BlockSpec((Cout, 1), lambda n: (0, 0)),              # resident scale
            pl.BlockSpec((Cout, 1), lambda n: (0, 0)),              # resident shift
        ],
        out_specs=pl.BlockSpec((1, Cout, HW_pad), lambda n: (n, 0, 0)),
        input_output_aliases={0: 0},                                # normalize y in place
        compiler_params=pltpu.CompilerParams(
            dimension_semantics=("parallel",)),
    )(y, scale, shift)

    # Drop width-padding / round-up lanes; result is already NCHW (no transpose).
    out = out[:, :, :HW].reshape(N, Cout, H_out, Wp)[:, :, :, :W_out]
    return out


def _reference(x_nchw, conv_w, conv_b, bn_gamma, bn_beta, pad=1):
    # pure-JAX reference for sanity checking (matches PyTorch training-mode BN)
    y = jax.lax.conv_general_dilated(
        x_nchw, conv_w, window_strides=(1, 1),
        padding=((pad, pad), (pad, pad)),
        dimension_numbers=("NCHW", "OIHW", "NCHW"))
    y = y + conv_b[None, :, None, None]
    y = jnp.maximum(y, 0.0)
    mean = jnp.mean(y, axis=(0, 2, 3), keepdims=True)
    var = jnp.mean((y - mean) ** 2, axis=(0, 2, 3), keepdims=True)
    return ((y - mean) * jax.lax.rsqrt(var + EPS)
            * bn_gamma[None, :, None, None] + bn_beta[None, :, None, None])


if __name__ == "__main__":
    key = jax.random.PRNGKey(0)
    kx, kw, kb = jax.random.split(key, 3)

    N, Cin, H, W = 2, 4, 16, 16
    Cout, K, PAD = 8, 3, 1

    x = jax.random.normal(kx, (N, Cin, H, W), dtype=jnp.float32)
    # deterministic parameter init (shapes per nn.Conv2d / nn.BatchNorm2d)
    conv_w = 0.1 * jax.random.normal(kw, (Cout, Cin, K, K), dtype=jnp.float32)
    conv_b = 0.1 * jax.random.normal(kb, (Cout,), dtype=jnp.float32)
    bn_gamma = jnp.ones((Cout,), jnp.float32)    # PyTorch BN default weight=1
    bn_beta = jnp.zeros((Cout,), jnp.float32)    # PyTorch BN default bias=0

    out = conv_block_forward(x, conv_w, conv_b, bn_gamma, bn_beta, k=K, pad=PAD)
    out = jax.block_until_ready(out)

    ref = _reference(x, conv_w, conv_b, bn_gamma, bn_beta, pad=PAD)
    assert out.shape == (N, Cout, H, W)
    assert jnp.allclose(out, ref, atol=1e-4, rtol=1e-4), "mismatch vs reference"

    print("KERNEL_OK")
</pallas_src>

<mosaic_0001>
module attributes {stable_mosaic.version = 11 : i64} {
  func.func @_bn_apply_kernel(%arg0: i32, %arg1: memref<1x8x384xf32, #tpu.memory_space<vmem>>, %arg2: memref<8x1xf32, #tpu.memory_space<vmem>>, %arg3: memref<8x1xf32, #tpu.memory_space<vmem>>, %arg4: memref<1x8x384xf32, #tpu.memory_space<vmem>>) attributes {dimension_semantics = [#tpu.dimension_semantics<parallel>], iteration_bounds = array<i64: 2>, scalar_prefetch = 0 : i64, scratch_operands = 0 : i64, tpu.core_type = #tpu.core_type<tc>, window_params = [{transform_indices = @transform_0, window_bounds = array<i64: 1, 8, 384>}, {pipeline_mode = #tpu.pipeline_mode<synchronous>, transform_indices = @transform_1, window_bounds = array<i64: 8, 1>}, {pipeline_mode = #tpu.pipeline_mode<synchronous>, transform_indices = @transform_2, window_bounds = array<i64: 8, 1>}, {transform_indices = @transform_3, window_bounds = array<i64: 1, 8, 384>}]} {
    %c0 = arith.constant 0 : index
    %c0_0 = arith.constant 0 : index
    %c0_1 = arith.constant 0 : index
    %0 = vector.load %arg1[%c0, %c0_0, %c0_1] : memref<1x8x384xf32, #tpu.memory_space<vmem>>, vector<1x8x384xf32>
    %1 = vector.shape_cast %0 : vector<1x8x384xf32> to vector<8x384xf32>
    %c0_2 = arith.constant 0 : index
    %c0_3 = arith.constant 0 : index
    %2 = vector.load %arg2[%c0_2, %c0_3] : memref<8x1xf32, #tpu.memory_space<vmem>>, vector<8x1xf32>
    %3 = vector.broadcast %2 : vector<8x1xf32> to vector<8x384xf32>
    %4 = arith.mulf %1, %3 : vector<8x384xf32>
    %c0_4 = arith.constant 0 : index
    %c0_5 = arith.constant 0 : index
    %5 = vector.load %arg3[%c0_4, %c0_5] : memref<8x1xf32, #tpu.memory_space<vmem>>, vector<8x1xf32>
    %6 = vector.broadcast %5 : vector<8x1xf32> to vector<8x384xf32>
    %7 = arith.addf %4, %6 : vector<8x384xf32>
    %c0_6 = arith.constant 0 : index
    %c0_7 = arith.constant 0 : index
    %c0_8 = arith.constant 0 : index
    %8 = vector.load %arg4[%c0_6, %c0_7, %c0_8] : memref<1x8x384xf32, #tpu.memory_space<vmem>>, vector<1x8x384xf32>
    %9 = vector.shape_cast %8 : vector<1x8x384xf32> to vector<8x384xf32>
    %10 = vector.shape_cast %7 : vector<8x384xf32> to vector<1x8x384xf32>
    tpu.vector_store %arg4[%c0_6, %c0_7, %c0_8], %10 {strides = array<i32>} : memref<1x8x384xf32, #tpu.memory_space<vmem>>, vector<1x8x384xf32>,
    return
  }
  func.func @transform_0(%arg0: i32) -> (i32, i32, i32) {
    %c0_i32 = arith.constant 0 : i32
    %c0_i32_0 = arith.constant 0 : i32
    %c0_i32_1 = arith.constant 0 : i32
    return %arg0, %c0_i32, %c0_i32_0 : i32, i32, i32
  }
  func.func @transform_1(%arg0: i32) -> (i32, i32) {
    %c0_i32 = arith.constant 0 : i32
    %c0_i32_0 = arith.constant 0 : i32
    %c0_i32_1 = arith.constant 0 : i32
    return %c0_i32, %c0_i32_0 : i32, i32
  }
  func.func @transform_2(%arg0: i32) -> (i32, i32) {
    %c0_i32 = arith.constant 0 : i32
    %c0_i32_0 = arith.constant 0 : i32
    %c0_i32_1 = arith.constant 0 : i32
    return %c0_i32, %c0_i32_0 : i32, i32
  }
  func.func @transform_3(%arg0: i32) -> (i32, i32, i32) {
    %c0_i32 = arith.constant 0 : i32
    %c0_i32_0 = arith.constant 0 : i32
    %c0_i32_1 = arith.constant 0 : i32
    return %arg0, %c0_i32, %c0_i32_0 : i32, i32, i32
  }
}

module attributes {stable_mosaic.version = 11 : i64} {
  func.func @kernel(%arg0: i32, %arg1: memref<1x4x432xf32, #tpu.memory_space<vmem>>, %arg2: memref<9x8x4xf32, #tpu.memory_space<vmem>>, %arg3: memref<8x1xf32, #tpu.memory_space<vmem>>, %arg4: memref<1x8x384xf32, #tpu.memory_space<vmem>>, %arg5: memref<1x8x2xf32, #tpu.memory_space<vmem>>) attributes {dimension_semantics = [#tpu.dimension_semantics<parallel>], iteration_bounds = array<i64: 2>, scalar_prefetch = 0 : i64, scratch_operands = 0 : i64, tpu.core_type = #tpu.core_type<tc>, window_params = [{transform_indices = @transform_0, window_bounds = array<i64: 1, 4, 432>}, {pipeline_mode = #tpu.pipeline_mode<synchronous>, transform_indices = @transform_1, window_bounds = array<i64: 9, 8, 4>}, {pipeline_mode = #tpu.pipeline_mode<synchronous>, transform_indices = @transform_2, window_bounds = array<i64: 8, 1>}, {transform_indices = @transform_3, window_bounds = array<i64: 1, 8, 384>}, {transform_indices = @transform_4, window_bounds = array<i64: 1, 8, 2>}]} {
    %c0 = arith.constant 0 : index
    %c0_0 = arith.constant 0 : index
    %c0_1 = arith.constant 0 : index
    %0 = vector.load %arg1[%c0, %c0_0, %c0_1] : memref<1x4x432xf32, #tpu.memory_space<vmem>>, vector<1x4x432xf32>
    %1 = vector.shape_cast %0 : vector<1x4x432xf32> to vector<4x432xf32>
    %cst = arith.constant 0.000000e+00 : f32
    %2 = vector.broadcast %cst : f32 to vector<8x384xf32>
    %3 = vector.extract_strided_slice %1 {offsets = [0, 0], sizes = [4, 384], strides = [1, 1]} : vector<4x432xf32> to vector<4x384xf32>
    %c0_2 = arith.constant 0 : index
    %c0_3 = arith.constant 0 : index
    %c0_4 = arith.constant 0 : index
    %4 = vector.load %arg2[%c0_2, %c0_3, %c0_4] : memref<9x8x4xf32, #tpu.memory_space<vmem>>, vector<1x8x4xf32>
    %5 = vector.shape_cast %4 : vector<1x8x4xf32> to vector<8x4xf32>
    %cst_5 = arith.constant dense<0.000000e+00> : vector<8x384xf32>
    %6 = tpu.matmul %5, %3, %cst_5 {dimension_numbers = #tpu.dot_dimension_numbers<[1], [0], [0], [1], [0, 0, 1, 1], [], []>} : vector<8x4xf32>, vector<4x384xf32>, vector<8x384xf32> -> vector<8x384xf32>
    %7 = arith.addf %2, %6 : vector<8x384xf32>
    %8 = vector.extract_strided_slice %1 {offsets = [0, 1], sizes = [4, 384], strides = [1, 1]} : vector<4x432xf32> to vector<4x384xf32>
    %c1 = arith.constant 1 : index
    %c0_6 = arith.constant 0 : index
    %c0_7 = arith.constant 0 : index
    %9 = vector.load %arg2[%c1, %c0_6, %c0_7] : memref<9x8x4xf32, #tpu.memory_space<vmem>>, vector<1x8x4xf32>
    %10 = vector.shape_cast %9 : vector<1x8x4xf32> to vector<8x4xf32>
    %cst_8 = arith.constant dense<0.000000e+00> : vector<8x384xf32>
    %11 = tpu.matmul %10, %8, %cst_8 {dimension_numbers = #tpu.dot_dimension_numbers<[1], [0], [0], [1], [0, 0, 1, 1], [], []>} : vector<8x4xf32>, vector<4x384xf32>, vector<8x384xf32> -> vector<8x384xf32>
    %12 = arith.addf %7, %11 : vector<8x384xf32>
    %13 = vector.extract_strided_slice %1 {offsets = [0, 2], sizes = [4, 384], strides = [1, 1]} : vector<4x432xf32> to vector<4x384xf32>
    %c2 = arith.constant 2 : index
    %c0_9 = arith.constant 0 : index
    %c0_10 = arith.constant 0 : index
    %14 = vector.load %arg2[%c2, %c0_9, %c0_10] : memref<9x8x4xf32, #tpu.memory_space<vmem>>, vector<1x8x4xf32>
    %15 = vector.shape_cast %14 : vector<1x8x4xf32> to vector<8x4xf32>
    %cst_11 = arith.constant dense<0.000000e+00> : vector<8x384xf32>
    %16 = tpu.matmul %15, %13, %cst_11 {dimension_numbers = #tpu.dot_dimension_numbers<[1], [0], [0], [1], [0, 0, 1, 1], [], []>} : vector<8x4xf32>, vector<4x384xf32>, vector<8x384xf32> -> vector<8x384xf32>
    %17 = arith.addf %12, %16 : vector<8x384xf32>
    %18 = vector.extract_strided_slice %1 {offsets = [0, 18], sizes = [4, 384], strides = [1, 1]} : vector<4x432xf32> to vector<4x384xf32>
    %c3 = arith.constant 3 : index
    %c0_12 = arith.constant 0 : index
    %c0_13 = arith.constant 0 : index
    %19 = vector.load %arg2[%c3, %c0_12, %c0_13] : memref<9x8x4xf32, #tpu.memory_space<vmem>>, vector<1x8x4xf32>
    %20 = vector.shape_cast %19 : vector<1x8x4xf32> to vector<8x4xf32>
    %cst_14 = arith.constant dense<0.000000e+00> : vector<8x384xf32>
    %21 = tpu.matmul %20, %18, %cst_14 {dimension_numbers = #tpu.dot_dimension_numbers<[1], [0], [0], [1], [0, 0, 1, 1], [], []>} : vector<8x4xf32>, vector<4x384xf32>, vector<8x384xf32> -> vector<8x384xf32>
    %22 = arith.addf %17, %21 : vector<8x384xf32>
    %23 = vector.extract_strided_slice %1 {offsets = [0, 19], sizes = [4, 384], strides = [1, 1]} : vector<4x432xf32> to vector<4x384xf32>
    %c4 = arith.constant 4 : index
    %c0_15 = arith.constant 0 : index
    %c0_16 = arith.constant 0 : index
    %24 = vector.load %arg2[%c4, %c0_15, %c0_16] : memref<9x8x4xf32, #tpu.memory_space<vmem>>, vector<1x8x4xf32>
    %25 = vector.shape_cast %24 : vector<1x8x4xf32> to vector<8x4xf32>
    %cst_17 = arith.constant dense<0.000000e+00> : vector<8x384xf32>
    %26 = tpu.matmul %25, %23, %cst_17 {dimension_numbers = #tpu.dot_dimension_numbers<[1], [0], [0], [1], [0, 0, 1, 1], [], []>} : vector<8x4xf32>, vector<4x384xf32>, vector<8x384xf32> -> vector<8x384xf32>
    %27 = arith.addf %22, %26 : vector<8x384xf32>
    %28 = vector.extract_strided_slice %1 {offsets = [0, 20], sizes = [4, 384], strides = [1, 1]} : vector<4x432xf32> to vector<4x384xf32>
    %c5 = arith.constant 5 : index
    %c0_18 = arith.constant 0 : index
    %c0_19 = arith.constant 0 : index
    %29 = vector.load %arg2[%c5, %c0_18, %c0_19] : memref<9x8x4xf32, #tpu.memory_space<vmem>>, vector<1x8x4xf32>
    %30 = vector.shape_cast %29 : vector<1x8x4xf32> to vector<8x4xf32>
    %cst_20 = arith.constant dense<0.000000e+00> : vector<8x384xf32>
    %31 = tpu.matmul %30, %28, %cst_20 {dimension_numbers = #tpu.dot_dimension_numbers<[1], [0], [0], [1], [0, 0, 1, 1], [], []>} : vector<8x4xf32>, vector<4x384xf32>, vector<8x384xf32> -> vector<8x384xf32>
    %32 = arith.addf %27, %31 : vector<8x384xf32>
    %33 = vector.extract_strided_slice %1 {offsets = [0, 36], sizes = [4, 384], strides = [1, 1]} : vector<4x432xf32> to vector<4x384xf32>
    %c6 = arith.constant 6 : index
    %c0_21 = arith.constant 0 : index
    %c0_22 = arith.constant 0 : index
    %34 = vector.load %arg2[%c6, %c0_21, %c0_22] : memref<9x8x4xf32, #tpu.memory_space<vmem>>, vector<1x8x4xf32>
    %35 = vector.shape_cast %34 : vector<1x8x4xf32> to vector<8x4xf32>
    %cst_23 = arith.constant dense<0.000000e+00> : vector<8x384xf32>
    %36 = tpu.matmul %35, %33, %cst_23 {dimension_numbers = #tpu.dot_dimension_numbers<[1], [0], [0], [1], [0, 0, 1, 1], [], []>} : vector<8x4xf32>, vector<4x384xf32>, vector<8x384xf32> -> vector<8x384xf32>
    %37 = arith.addf %32, %36 : vector<8x384xf32>
    %38 = vector.extract_strided_slice %1 {offsets = [0, 37], sizes = [4, 384], strides = [1, 1]} : vector<4x432xf32> to vector<4x384xf32>
    %c7 = arith.constant 7 : index
    %c0_24 = arith.constant 0 : index
    %c0_25 = arith.constant 0 : index
    %39 = vector.load %arg2[%c7, %c0_24, %c0_25] : memref<9x8x4xf32, #tpu.memory_space<vmem>>, vector<1x8x4xf32>
    %40 = vector.shape_cast %39 : vector<1x8x4xf32> to vector<8x4xf32>
    %cst_26 = arith.constant dense<0.000000e+00> : vector<8x384xf32>
    %41 = tpu.matmul %40, %38, %cst_26 {dimension_numbers = #tpu.dot_dimension_numbers<[1], [0], [0], [1], [0, 0, 1, 1], [], []>} : vector<8x4xf32>, vector<4x384xf32>, vector<8x384xf32> -> vector<8x384xf32>
    %42 = arith.addf %37, %41 : vector<8x384xf32>
    %43 = vector.extract_strided_slice %1 {offsets = [0, 38], sizes = [4, 384], strides = [1, 1]} : vector<4x432xf32> to vector<4x384xf32>
    %c8 = arith.constant 8 : index
    %c0_27 = arith.constant 0 : index
    %c0_28 = arith.constant 0 : index
    %44 = vector.load %arg2[%c8, %c0_27, %c0_28] : memref<9x8x4xf32, #tpu.memory_space<vmem>>, vector<1x8x4xf32>
    %45 = vector.shape_cast %44 : vector<1x8x4xf32> to vector<8x4xf32>
    %cst_29 = arith.constant dense<0.000000e+00> : vector<8x384xf32>
    %46 = tpu.matmul %45, %43, %cst_29 {dimension_numbers = #tpu.dot_dimension_numbers<[1], [0], [0], [1], [0, 0, 1, 1], [], []>} : vector<8x4xf32>, vector<4x384xf32>, vector<8x384xf32> -> vector<8x384xf32>
    %47 = arith.addf %42, %46 : vector<8x384xf32>
    %c0_30 = arith.constant 0 : index
    %c0_31 = arith.constant 0 : index
    %48 = vector.load %arg3[%c0_30, %c0_31] : memref<8x1xf32, #tpu.memory_space<vmem>>, vector<8x1xf32>
    %49 = vector.broadcast %48 : vector<8x1xf32> to vector<8x384xf32>
    %50 = arith.addf %47, %49 : vector<8x384xf32>
    %cst_32 = arith.constant 0.000000e+00 : f32
    %51 = vector.broadcast %cst_32 : f32 to vector<8x384xf32>
    %52 = arith.maximumf %50, %51 : vector<8x384xf32>
    %c0_33 = arith.constant 0 : index
    %c0_34 = arith.constant 0 : index
    %c0_35 = arith.constant 0 : index
    %53 = vector.load %arg4[%c0_33, %c0_34, %c0_35] : memref<1x8x384xf32, #tpu.memory_space<vmem>>, vector<1x8x384xf32>
    %54 = vector.shape_cast %53 : vector<1x8x384xf32> to vector<8x384xf32>
    %55 = vector.shape_cast %52 : vector<8x384xf32> to vector<1x8x384xf32>
    tpu.vector_store %arg4[%c0_33, %c0_34, %c0_35], %55 {strides = array<i32>} : memref<1x8x384xf32, #tpu.memory_space<vmem>>, vector<1x8x384xf32>,
    %56 = tpu.iota {dimensions = array<i32: 1>} : vector<1x384xi32>
    %c18_i32 = arith.constant 18 : i32
    %c0_i32 = arith.constant 0 : i32
    %57 = arith.cmpi eq, %c18_i32, %c0_i32 : i32
    %c1_i32 = arith.constant 1 : i32
    %58 = arith.select %57, %c1_i32, %c18_i32 : i32
    %59 = vector.broadcast %58 : i32 to vector<1x384xi32>
    %60 = arith.remsi %56, %59 : vector<1x384xi32>
    %c0_i32_36 = arith.constant 0 : i32
    %61 = vector.broadcast %c0_i32_36 : i32 to vector<1x384xi32>
    %62 = arith.cmpi ne, %60, %61 : vector<1x384xi32>
    %c0_i32_37 = arith.constant 0 : i32
    %63 = vector.broadcast %c0_i32_37 : i32 to vector<1x384xi32>
    %64 = arith.cmpi slt, %60, %63 : vector<1x384xi32>
    %c0_i32_38 = arith.constant 0 : i32
    %65 = arith.cmpi slt, %58, %c0_i32_38 : i32
    %66 = vector.broadcast %65 : i1 to vector<1x384xi1>
    %67 = vector.broadcast %66 : vector<1x384xi1> to vector<1x384xi1>
    %68 = arith.xori %64, %67 : vector<1x384xi1>
    %69 = arith.andi %68, %62 : vector<1x384xi1>
    %70 = vector.broadcast %58 : i32 to vector<1x384xi32>
    %71 = arith.addi %60, %70 : vector<1x384xi32>
    %72 = arith.select %69, %71, %60 : vector<1x384xi1>, vector<1x384xi32>
    %c16_i32 = arith.constant 16 : i32
    %73 = vector.broadcast %c16_i32 : i32 to vector<1x384xi32>
    %74 = arith.cmpi slt, %72, %73 : vector<1x384xi32>
    %c288_i32 = arith.constant 288 : i32
    %75 = vector.broadcast %c288_i32 : i32 to vector<1x384xi32>
    %76 = arith.cmpi slt, %56, %75 : vector<1x384xi32>
    %77 = arith.andi %74, %76 : vector<1x384xi1>
    %cst_39 = arith.constant 0.000000e+00 : f32
    %78 = vector.shape_cast %77 : vector<1x384xi1> to vector<1x384xi1>
    %79 = vector.broadcast %78 : vector<1x384xi1> to vector<8x384xi1>
    %80 = vector.broadcast %cst_39 : f32 to vector<8x384xf32>
    %81 = arith.select %79, %52, %80 : vector<8x384xi1>, vector<8x384xf32>
    %cst_40 = arith.constant dense<0.000000e+00> : vector<8xf32>
    %82 = vector.multi_reduction <add>, %81, %cst_40 [1] : vector<8x384xf32> to vector<8xf32>
    %83 = vector.shape_cast %82 : vector<8xf32> to vector<8x1xf32>
    %84 = arith.mulf %81, %81 : vector<8x384xf32>
    %cst_41 = arith.constant dense<0.000000e+00> : vector<8xf32>
    %85 = vector.multi_reduction <add>, %84, %cst_41 [1] : vector<8x384xf32> to vector<8xf32>
    %86 = vector.shape_cast %85 : vector<8xf32> to vector<8x1xf32>
    %87 = tpu.concatenate %83, %86 in 1 : vector<8x1xf32>, vector<8x1xf32> -> vector<8x2xf32>
    %c0_42 = arith.constant 0 : index
    %c0_43 = arith.constant 0 : index
    %c0_44 = arith.constant 0 : index
    %88 = vector.load %arg5[%c0_42, %c0_43, %c0_44] : memref<1x8x2xf32, #tpu.memory_space<vmem>>, vector<1x8x2xf32>
    %89 = vector.shape_cast %88 : vector<1x8x2xf32> to vector<8x2xf32>
    %90 = vector.shape_cast %87 : vector<8x2xf32> to vector<1x8x2xf32>
    tpu.vector_store %arg5[%c0_42, %c0_43, %c0_44], %90 {strides = array<i32>} : memref<1x8x2xf32, #tpu.memory_space<vmem>>, vector<1x8x2xf32>,
    return
  }
  func.func @transform_0(%arg0: i32) -> (i32, i32, i32) {
    %c0_i32 = arith.constant 0 : i32
    %c0_i32_0 = arith.constant 0 : i32
    %c0_i32_1 = arith.constant 0 : i32
    return %arg0, %c0_i32, %c0_i32_0 : i32, i32, i32
  }
  func.func @transform_1(%arg0: i32) -> (i32, i32, i32) {
    %c0_i32 = arith.constant 0 : i32
    %c0_i32_0 = arith.constant 0 : i32
    %c0_i32_1 = arith.constant 0 : i32
    %c0_i32_2 = arith.constant 0 : i32
    return %c0_i32, %c0_i32_0, %c0_i32_1 : i32, i32, i32
  }
  func.func @transform_2(%arg0: i32) -> (i32, i32) {
    %c0_i32 = arith.constant 0 : i32
    %c0_i32_0 = arith.constant 0 : i32
    %c0_i32_1 = arith.constant 0 : i32
    return %c0_i32, %c0_i32_0 : i32, i32
  }
  func.func @transform_3(%arg0: i32) -> (i32, i32, i32) {
    %c0_i32 = arith.constant 0 : i32
    %c0_i32_0 = arith.constant 0 : i32
    %c0_i32_1 = arith.constant 0 : i32
    return %arg0, %c0_i32, %c0_i32_0 : i32, i32, i32
  }
  func.func @transform_4(%arg0: i32) -> (i32, i32, i32) {
    %c0_i32 = arith.constant 0 : i32
    %c0_i32_0 = arith.constant 0 : i32
    %c0_i32_1 = arith.constant 0 : i32
    return %arg0, %c0_i32, %c0_i32_0 : i32, i32, i32
  }
}

</mosaic_0001>

<bundles_post_ra>
// kernel: conv_block_forward.3
= control target key start
LH: loop header
LB: loop body
LE: loop exit
PB: predicated region body
PF: predicated region fallthrough
CT: control target
= control target key end

     0   :  { %s299_s12 = smov 0   ;;  %s322_s0 = inlined_call_operand.vmem [shape: f32[2,8,384], index: 0, kind: input, shape index: {}, may-alias: {0,3}]   ;;  %s323_s1 = inlined_call_operand.vmem [shape: f32[8,1], index: 1, kind: input, shape index: {}]   ;;  %s324_s2 = inlined_call_operand.vmem [shape: f32[8,1], index: 2, kind: input, shape index: {}]   ;;  %s325_s3 = inlined_call_operand.vmem [shape: f32[2,8,384], index: 3, kind: output, shape index: {}, may-alias: {0,3}]  }
   0x1 LB: > { %s250_s13 = sadd.s32 4294967295, %s276_s12   ;;  %p254_p0 = scmp.ge.s32.totalorder %s276_s12, 1  ;;  %s276_s12 = sphi %s299_s12, %s13_s12  }
   0x2   : > { %p137_p1 = scmp.lt.s32.totalorder %s276_s12, 3 }
   0x4   : > { %p138_p2 = pnand %p254_p0, %p137_p1 }
   0x5   : > { %p161_p3 = scmp.lt.s32.totalorder (!%p138_p2), %s250_s13, 1 }
   0x6   : > { %141 = sbr.rel (%p138_p2) target bundleno = 141 (0x8d), region = 32 }
   0xb   : > { %v174_v0 = vld [vmem:[%s323_s1] sm:$0xff]  ;;  %v278_v1 = vmov 0   ;;  %s327_s13 = smov (!%p161_p3, %s250_s13), 1 }
   0xc   : > { %269 = vset.pattern.permute.xlu0 %v278_v1  ;;  %v183_v2 = vld [vmem:[%s324_s2] sm:$0xff]  ;;  %s259_s18 = smul.u32 24, %s327_s13 }
   0xd   : > { %177 = vperm.xlu0 %269, %v174_v0  }
   0xe   : > { %s165_s21 = scalar_lea.vmem %s322_s0, %s259_s18  ;;  %s170_s24 = scalar_lea.vmem %s325_s3, %s259_s18 }
   0xf   : > { %v171_v4 = vld [vmem:[%s165_s21] sm:$0xff]  ;;  %v172_v5 = vld [vmem:[%s165_s21 + $0x8] sm:$0xff]  ;;  %v173_v6 = vld [vmem:[%s165_s21 + $0x10] sm:$0xff] }
  0x15   : > { %186 = vperm.xlu0 %269, %v183_v2  }
  0x7f   : > { %v178_v3 = vpop.permute.xlu0 %177 }
  0x80   : > { %v180_v7 = vmul.f32 %v178_v3, %v171_v4  ;;  %v181_v8 = vmul.f32 %v178_v3, %v172_v5  ;;  %v182_v9 = vmul.f32 %v178_v3, %v173_v6 }
  0x87   : > { %v187_v10 = vpop.permute.xlu0 %186 }
  0x88   : > { %v189_v11 = vadd.f32 %v187_v10, %v180_v7  ;;  %v190_v12 = vadd.f32 %v187_v10, %v181_v8  ;;  %v191_v13 = vadd.f32 %v187_v10, %v182_v9 }
  0x8a   : > { %192 = vst [vmem:[%s170_s24] sm:$0xff] %v189_v11 }
  0x8b   : > { %193 = vst [vmem:[%s170_s24 + $0x8] sm:$0xff] %v190_v12 }
  0x8c   : > { %194 = vst [vmem:[%s170_s24 + $0x10] sm:$0xff] %v191_v13 }
  0x8d PF: > { %s13_s12 = sadd.s32 1, %s276_s12  }
  0x8e   : > { %p10_p4 = scmp.ge.s32.totalorder %s13_s12, 4  }
  0x90   :  { %12 = sbr.rel (!%p10_p4) target bundleno = 1 (0x1), region = 62 }

// kernel: conv_block_forward.2
= control target key start
LH: loop header
LB: loop body
LE: loop exit
PB: predicated region body
PF: predicated region fallthrough
CT: control target
= control target key end

     0   :  { %s1408_s15 = smov 0   ;;  %s1622_s0 = inlined_call_operand.vmem [shape: f32[2,4,432], index: 0, kind: input, shape index: {}]   ;;  %s1623_s1 = inlined_call_operand.vmem [shape: f32[9,8,4], index: 1, kind: input, shape index: {}]   ;;  %s1624_s2 = inlined_call_operand.vmem [shape: f32[8,1], index: 2, kind: input, shape index: {}]   ;;  %s1625_s3 = inlined_call_operand.vmem [shape: f32[2,8,384], index: 3, kind: output, shape index: {0}]   ;;  %s1626_s4 = inlined_call_operand.vmem [shape: f32[2,8,2], index: 4, kind: output, shape index: {1}]  }
   0x1 LB: > { %s1272_s16 = sadd.s32 4294967295, %s1372_s15   ;;  %p1276_p0 = scmp.ge.s32.totalorder %s1372_s15, 1  ;;  %s1372_s15 = sphi %s1408_s15, %s15_s15  }
   0x2   : > { %p165_p1 = scmp.lt.s32.totalorder %s1372_s15, 3 }
   0x4   : > { %p166_p2 = pnand %p1276_p0, %p165_p1 }
   0x5   : > { %p195_p3 = scmp.lt.s32.totalorder (!%p166_p2), %s1272_s16, 1  ;;  %s1374_s21 = smov (!%p166_p2), 127  }
   0x6   : > { %169 = sbr.rel (%p166_p2) target bundleno = 487 (0x1e7), region = 32  ;;  %s1375_s22 = smov (!%p166_p2), 126  }
   0x7   : > { %s1376_s23 = smov (!%p166_p2), 110   ;;  %s1377_s24 = smov (!%p166_p2), 109  }
   0x8   : > { %s1378_s25 = smov (!%p166_p2), 108   ;;  %s1379_s26 = smov (!%p166_p2), 92  }
   0x9   : > { %s1380_s27 = smov (!%p166_p2), 91   ;;  %s1381_s28 = smov (!%p166_p2), 90  }
   0xb   : > { %s1634_s16 = smov (!%p195_p3, %s1272_s16), 1  ;;  %vm239_vm0 = vcmask 1043456   ;;  %vm235_vm1 = vcmask 31744   ;;  %v211_v38 = vld [vmem:[%s1623_s1] sm:$0xff]  ;;  %vm231_vm2 = vcmask 1039360   ;;  %vm398_vm3 = vcmask 1031168  }
   0xc   : > { %s1345_s17 = sshll.u32 %s1634_s16, 4  ;;  %v1281_v49 = vld [vmem:[%s1623_s1 + $0x8] sm:$0xff]  ;;  %vm491_vm4 = vcmask 900096   ;;  %v1294_v53 = vld [vmem:[%s1623_s1 + $0x10] sm:$0xff]  ;;  %v1301_v59 = vld [vmem:[%s1623_s1 + $0x18] sm:$0xff]  ;;  %vm584_vm5 = vcmask 891904  }
   0xd   : > { %s199_s20 = scalar_lea.vmem %s1622_s0, %s1345_s17  ;;  %vm677_vm6 = vcmask 883712   ;;  %vm770_vm7 = vcmask 752640   ;;  %vm863_vm8 = vcmask 744448   ;;  %vm956_vm9 = vcmask 736256   ;;  %s1280_s29 = sshll.u32 %s1634_s16, 3 }
   0xe   : > { %v1422_v0 = vld [vmem:[%s199_s20 + $0x8] sm:$0xff]  ;;  %v1424_v1 = vld [vmem:[%s199_s20] sm:$0xff]  ;;  %s208_s6 = scalar_lea.vmem %s1626_s4, %s1280_s29 }
   0xf   : > { %218 = vst [vmem:[#allocation1 + $0x10] ss:$2 sm:$0xff] %v1422_v0 }
  0x10   : > { %216 = vst [vmem:[#allocation1] ss:$2 sm:$0xff] %v1424_v1 }
  0x16   : > { %v221_v2 = vld.sshfl [vmem:[#allocation1 + $0x10] sm:$0xff pattern:$0x75316420]  ;;  %v222_v3 = vld.sshfl [vmem:[#allocation1 + $0x18] sm:$0xff pattern:$0x75316420] }
  0x17   : > { %227 = vrot.lane.b32.xlu0 %v221_v2, %s1374_s21  ;;  %v219_v4 = vld.sshfl [vmem:[#allocation1] sm:$0xff pattern:$0x75316420]  ;;  %308 = vst [vmem:[#allocation1 + $0x10] ss:$2 sm:$0xff] %v1422_v0 }
  0x18   : > { %223 = vrot.lane.b32.xlu1 %v219_v4, %s1374_s21  ;;  %v220_v5 = vld.sshfl [vmem:[#allocation1 + $0x8] sm:$0xff pattern:$0x75316420]  ;;  %v1308_v2 = vld [vmem:[%s1623_s1 + $0x20] sm:$0xff] }
  0x19   : > { %306 = vst [vmem:[#allocation1] ss:$2 sm:$0xff] %v1424_v1 }
  0x1e   : > { %v1430_v6 = vld.sshfl [vmem:[#allocation1 + $0x10] sm:$0xff pattern:$0x75316420] }
  0x1f   : > { %229 = vrot.lane.b32.xlu0 %v222_v3, %s1374_s21  ;;  %385 = vst [vmem:[#allocation1 + $0x10] ss:$2 sm:$0xff] %v1422_v0 }
  0x20   : > { %225 = vrot.lane.b32.xlu1 %v220_v5, %s1374_s21  ;;  %v1433_v7 = vld.sshfl [vmem:[#allocation1] sm:$0xff pattern:$0x75316420]  ;;  %v1435_v8 = vld.sshfl [vmem:[#allocation1 + $0x8] sm:$0xff pattern:$0x75316420] }
  0x21   : > { %383 = vst [vmem:[#allocation1] ss:$2 sm:$0xff] %v1424_v1  ;;  %1288 = vmatpush.msk.msra.mxu3 %vm239_vm0, %v1433_v7 }
  0x22   : > { %1289 = vmatmul.msk.f32.vlgmr.msra.gmra.mxu3 %vm235_vm1, %v211_v38 }
  0x26   : > { %v388_v9 = vld.sshfl [vmem:[#allocation1 + $0x10] sm:$0xff pattern:$0x75316420]  ;;  %v389_v10 = vld.sshfl [vmem:[#allocation1 + $0x18] sm:$0xff pattern:$0x75316420] }
  0x27   : > { %394 = vrot.lane.b32.xlu0 %v388_v9, %s1375_s22  ;;  %478 = vst [vmem:[#allocation1 + $0x10] ss:$2 sm:$0xff] %v1422_v0 }
  0x28   : > { %v386_v11 = vld.sshfl [vmem:[#allocation1] sm:$0xff pattern:$0x75316420]  ;;  %v387_v12 = vld.sshfl [vmem:[#allocation1 + $0x8] sm:$0xff pattern:$0x75316420] }
  0x29   : > { %390 = vrot.lane.b32.xlu2 %v386_v11, %s1375_s22  ;;  %476 = vst [vmem:[#allocation1] ss:$2 sm:$0xff] %v1424_v1 }
  0x2e   : > { %v481_v13 = vld.sshfl [vmem:[#allocation1 + $0x10] sm:$0xff pattern:$0x75316420]  ;;  %v482_v14 = vld.sshfl [vmem:[#allocation1 + $0x18] sm:$0xff pattern:$0x75316420] }
  0x2f   : > { %396 = vrot.lane.b32.xlu0 %v389_v10, %s1375_s22  ;;  %571 = vst [vmem:[#allocation1 + $0x10] ss:$2 sm:$0xff] %v1422_v0  ;;  %v1315_v10 = vld [vmem:[%s1623_s1 + $0x28] sm:$0xff] }
  0x30   : > { %v480_v15 = vld.sshfl [vmem:[#allocation1 + $0x8] sm:$0xff pattern:$0x75316420]  ;;  %v479_v16 = vld.sshfl [vmem:[#allocation1] sm:$0xff pattern:$0x75316420] }
  0x31   : > { %485 = vrot.lane.b32.xlu1 %v480_v15, %s1376_s23  ;;  %392 = vrot.lane.b32.xlu2 %v387_v12, %s1375_s22  ;;  %569 = vst [vmem:[#allocation1] ss:$2 sm:$0xff] %v1424_v1 }
  0x36   : > { %v574_v17 = vld.sshfl [vmem:[#allocation1 + $0x10] sm:$0xff pattern:$0x75316420]  ;;  %v575_v18 = vld.sshfl [vmem:[#allocation1 + $0x18] sm:$0xff pattern:$0x75316420] }
  0x37   : > { %580 = vrot.lane.b32.xlu0 %v574_v17, %s1377_s24  ;;  %664 = vst [vmem:[#allocation1 + $0x10] ss:$2 sm:$0xff] %v1422_v0  ;;  %v1322_v17 = vld [vmem:[%s1623_s1 + $0x30] sm:$0xff] }
  0x38   : > { %v572_v19 = vld.sshfl [vmem:[#allocation1] sm:$0xff pattern:$0x75316420]  ;;  %v573_v20 = vld.sshfl [vmem:[#allocation1 + $0x8] sm:$0xff pattern:$0x75316420] }
  0x39   : > { %483 = vrot.lane.b32.xlu1 %v479_v16, %s1376_s23  ;;  %487 = vrot.lane.b32.xlu2 %v481_v13, %s1376_s23  ;;  %662 = vst [vmem:[#allocation1] ss:$2 sm:$0xff] %v1424_v1 }
  0x3e   : > { %v667_v21 = vld.sshfl [vmem:[#allocation1 + $0x10] sm:$0xff pattern:$0x75316420]  ;;  %v668_v22 = vld.sshfl [vmem:[#allocation1 + $0x18] sm:$0xff pattern:$0x75316420] }
  0x3f   : > { %578 = vrot.lane.b32.xlu0 %v573_v20, %s1377_s24  ;;  %757 = vst [vmem:[#allocation1 + $0x10] ss:$2 sm:$0xff] %v1422_v0 }
  0x40   : > { %v665_v23 = vld.sshfl [vmem:[#allocation1] sm:$0xff pattern:$0x75316420]  ;;  %v666_v24 = vld.sshfl [vmem:[#allocation1 + $0x8] sm:$0xff pattern:$0x75316420] }
  0x41   : > { %582 = vrot.lane.b32.xlu1 %v575_v18, %s1377_s24  ;;  %489 = vrot.lane.b32.xlu2 %v482_v14, %s1376_s23  ;;  %755 = vst [vmem:[#allocation1] ss:$2 sm:$0xff] %v1424_v1 }
  0x46   : > { %v760_v25 = vld.sshfl [vmem:[#allocation1 + $0x10] sm:$0xff pattern:$0x75316420]  ;;  %v761_v26 = vld.sshfl [vmem:[#allocation1 + $0x18] sm:$0xff pattern:$0x75316420] }
  0x47   : > { %675 = vrot.lane.b32.xlu0 %v668_v22, %s1378_s25  ;;  %850 = vst [vmem:[#allocation1 + $0x10] ss:$2 sm:$0xff] %v1422_v0  ;;  %v1032_v22 = vld [vmem:[%s1624_s2] sm:$0xff] }
  0x48   : > { %v759_v27 = vld.sshfl [vmem:[#allocation1 + $0x8] sm:$0xff pattern:$0x75316420]  ;;  %v758_v28 = vld.sshfl [vmem:[#allocation1] sm:$0xff pattern:$0x75316420] }
  0x49   : > { %669 = vrot.lane.b32.xlu1 %v665_v23, %s1378_s25  ;;  %576 = vrot.lane.b32.xlu2 %v572_v19, %s1377_s24  ;;  %848 = vst [vmem:[#allocation1] ss:$2 sm:$0xff] %v1424_v1  ;;  %v1329_v19 = vld [vmem:[%s1623_s1 + $0x38] sm:$0xff]  ;;  %v1382_v23 = vmov 0  }
  0x4a   : > { %1364 = vset.pattern.permute.xlu2 %v1382_v23  ;;  %1365 = vset.pattern.permute.xlu0 %v1382_v23 }
  0x4e   : > { %v853_v29 = vld.sshfl [vmem:[#allocation1 + $0x10] sm:$0xff pattern:$0x75316420]  ;;  %v854_v30 = vld.sshfl [vmem:[#allocation1 + $0x18] sm:$0xff pattern:$0x75316420] }
  0x4f   : > { %762 = vrot.lane.b32.xlu0 %v758_v28, %s1379_s26  ;;  %943 = vst [vmem:[#allocation1 + $0x10] ss:$2 sm:$0xff] %v1422_v0 }
  0x50   : > { %v852_v31 = vld.sshfl [vmem:[#allocation1 + $0x8] sm:$0xff pattern:$0x75316420]  ;;  %v851_v32 = vld.sshfl [vmem:[#allocation1] sm:$0xff pattern:$0x75316420] }
  0x51   : > { %764 = vrot.lane.b32.xlu1 %v759_v27, %s1379_s26  ;;  %671 = vrot.lane.b32.xlu2 %v666_v24, %s1378_s25  ;;  %941 = vst [vmem:[#allocation1] ss:$2 sm:$0xff] %v1424_v1 }
  0x56   : > { %v946_v34 = vld.sshfl [vmem:[#allocation1 + $0x10] sm:$0xff pattern:$0x75316420]  ;;  %v947_v36 = vld.sshfl [vmem:[#allocation1 + $0x18] sm:$0xff pattern:$0x75316420] }
  0x57   : > { %859 = vrot.lane.b32.xlu0 %v853_v29, %s1380_s27 }
  0x58   : > { %v944_v33 = vld.sshfl [vmem:[#allocation1] sm:$0xff pattern:$0x75316420]  ;;  %v945_v35 = vld.sshfl [vmem:[#allocation1 + $0x8] sm:$0xff pattern:$0x75316420] }
  0x59   : > { %766 = vrot.lane.b32.xlu1 %v760_v25, %s1379_s26  ;;  %673 = vrot.lane.b32.xlu2 %v667_v21, %s1378_s25  ;;  %s1346_s25 = smul.u32 24, %s1634_s16 }
  0x5f   : > { %861 = vrot.lane.b32.xlu0 %v854_v30, %s1380_s27 }
  0x61   : > { %768 = vrot.lane.b32.xlu1 %v761_v26, %s1379_s26  ;;  %857 = vrot.lane.b32.xlu2 %v852_v31, %s1380_s27 }
  0x67   : > { %948 = vrot.lane.b32.xlu0 %v944_v33, %s1381_s28 }
  0x69   : > { %952 = vrot.lane.b32.xlu1 %v946_v34, %s1381_s28  ;;  %855 = vrot.lane.b32.xlu2 %v851_v32, %s1380_s27  ;;  %v1336_v34 = vld [vmem:[%s1623_s1 + $0x40] sm:$0xff] }
  0x71   : > { %950 = vrot.lane.b32.xlu1 %v945_v35, %s1381_s28  ;;  %954 = vrot.lane.b32.xlu2 %v947_v36, %s1381_s28  ;;  %s204_s28 = scalar_lea.vmem %s1625_s3, %s1346_s25 }
  0x79   : > { %1035 = vperm.xlu2 %1364, %v1032_v22  }
  0x83   : > { %v391_v37 = vpop.permute.xlu2 %390 }
  0x89   : > { %v228_v39 = vpop.permute.xlu0 %227 }
  0x8a   : > { %v224_v40 = vpop.permute.xlu1 %223 }
  0x8b   : > { %v393_v41 = vpop.permute.xlu2 %392 }
  0x8c   : > { %v399_v45 = vsel %vm398_vm3, %v391_v37, %v393_v41 }
  0x91   : > { %v230_v42 = vpop.permute.xlu0 %229 }
  0x92   : > { %v226_v43 = vpop.permute.xlu1 %225  ;;  %v234_v44 = vsel %vm231_vm2, %v228_v39, %v230_v42 }
  0x93   : > { %v232_v46 = vsel %vm231_vm2, %v224_v40, %v226_v43  ;;  %v233_v47 = vsel %vm231_vm2, %v226_v43, %v228_v39  ;;  %1286 = vmatpush.msk.msra.mxu2 %vm239_vm0, %v234_v44  ;;  %v488_v48 = vpop.permute.xlu2 %487  ;;  %v1047_v40 = vlaneseq }
  0x94   : > { %1282 = vmatpush.msk.msra.mxu0 %vm239_vm0, %v232_v46  ;;  %1284 = vmatpush.msk.msra.mxu1 %vm239_vm0, %v233_v47 }
  0x95   : > { %1295 = vmatpush.msk.msrb.mxu2 %vm239_vm0, %v399_v45  ;;  %1283 = vmatmul.msk.f32.vlgmr.msra.gmra.mxu0 %vm235_vm1, %v1281_v49  ;;  %v1556_v42 = vand.u32 127, %v1047_v40 }
  0x96   : > { %1290 = vmatpush.msk.msrb.mxu0 %vm239_vm0, %v1435_v8  ;;  %1287 = vmatmul.msk.f32.vlgmr.msra.gmra.mxu2 %vm235_vm1, %v1281_v49 }
  0x97   : > { %1285 = vmatmul.msk.f32.vlgmr.msra.gmra.mxu1 %vm235_vm1, %v1281_v49  ;;  %v1563_v45 = vadd.s32 256, %v1556_v42  ;;  %v1054_v49 = vand.u32 65535, %v1556_v42 }
  0x98   : > { %1292 = vmatpush.msk.msrb.mxu1 %vm239_vm0, %v1430_v6 }
  0x99   : > { %v395_v50 = vpop.permute.xlu0 %394  ;;  %v1112_v47 = vand.u32 65535, %v1563_v45 }
  0x9a   : > { %v400_v51 = vsel %vm398_vm3, %v393_v41, %v395_v50 }
  0x9b   : > { %1297 = vmatpush.msk.msrb.mxu3 %vm239_vm0, %v400_v51  ;;  %v490_v52 = vpop.permute.xlu2 %489  ;;  %v1113_v51 = vshrl.u32 %v1563_v45, 16 }
  0x9c   : > { %v494_v54 = vsel %vm491_vm4, %v488_v48, %v490_v52  ;;  %1298 = vmatmul.msk.f32.vlgmr.msrb.gmra.mxu3 %vm235_vm1, %v1294_v53  ;;  %v1116_v52 = vmul.u32 58254, %v1112_v47 }
  0x9d   : > { %1306 = vmatpush.msk.msra.mxu3 %vm239_vm0, %v494_v54  ;;  %1291 = vmatmul.msk.f32.vlgmr.msrb.gmra.mxu0 %vm235_vm1, %v211_v38  ;;  %v1058_v54 = vmul.u32 58254, %v1054_v49 }
  0x9e   : > { %1296 = vmatmul.msk.f32.vlgmr.msrb.gmra.mxu2 %vm235_vm1, %v1294_v53 }
  0x9f   : > { %1293 = vmatmul.msk.f32.vlgmr.msrb.gmra.mxu1 %vm235_vm1, %v211_v38 }
  0xa1   : > { %v397_v55 = vpop.permute.xlu0 %396 }
  0xa2   : > { %v401_v56 = vsel %vm398_vm3, %v395_v50, %v397_v55 }
  0xa3   : > { %v486_v57 = vpop.permute.xlu1 %485  ;;  %1299 = vmatpush.msk.msra.mxu0 %vm239_vm0, %v401_v56  ;;  %v577_v58 = vpop.permute.xlu2 %576 }
  0xa4   : > { %v493_v60 = vsel %vm491_vm4, %v486_v57, %v488_v48  ;;  %1307 = vmatmul.msk.f32.vlgmr.msra.gmra.mxu3 %vm235_vm1, %v1301_v59  ;;  %v1569_v48 = vadd.s32 128, %v1556_v42 }
  0xa5   : > { %1304 = vmatpush.msk.msra.mxu2 %vm239_vm0, %v493_v60  ;;  %1300 = vmatmul.msk.f32.vlgmr.msra.gmra.mxu0 %vm235_vm1, %v1294_v53  ;;  %v1565_v46 = vpop.f32.mrf.mxu3  ;;  %v1055_v53 = vshrl.u32 %v1556_v42, 16  ;;  %v1115_v60 = vmul.u32 14564, %v1112_v47 }
  0xa6   : > { %1305 = vmatmul.msk.f32.vlgmr.msra.gmra.mxu2 %vm235_vm1, %v1301_v59  ;;  %v1083_v50 = vand.u32 65535, %v1569_v48  ;;  %v1084_v55 = vshrl.u32 %v1569_v48, 16 }
  0xa8   : > { %v1087_v56 = vmul.u32 58254, %v1083_v50 }
  0xa9   : > { %v581_v61 = vpop.permute.xlu0 %580 }
  0xab   : > { %v484_v62 = vpop.permute.xlu1 %483  ;;  %v672_v63 = vpop.permute.xlu2 %671 }
  0xac   : > { %v492_v0 = vsel %vm491_vm4, %v484_v62, %v486_v57  ;;  %v1119_v62 = vshll.u32 %v1116_v52, 16 }
  0xad   : > { %1302 = vmatpush.msk.msra.mxu1 %vm239_vm0, %v492_v0  ;;  %v1059_v0 = vmul.u32 14564, %v1055_v53 }
  0xae   : > { %1303 = vmatmul.msk.f32.vlgmr.msra.gmra.mxu1 %vm235_vm1, %v1301_v59  ;;  %vm1123_vm10 = vc.u32 %v1115_v60, %v1119_v62 }
  0xb1   : > { %v579_v1 = vpop.permute.xlu0 %578 }
  0xb2   : > { %v585_v3 = vsel %vm584_vm5, %v577_v58, %v579_v1  ;;  %v586_v4 = vsel %vm584_vm5, %v579_v1, %v581_v61  ;;  %v1061_v1 = vshll.u32 %v1058_v54, 16 }
  0xb3   : > { %v583_v5 = vpop.permute.xlu1 %582  ;;  %1311 = vmatpush.msk.msrb.mxu1 %vm239_vm0, %v586_v4  ;;  %1309 = vmatpush.msk.msrb.mxu0 %vm239_vm0, %v585_v3  ;;  %v674_v6 = vpop.permute.xlu2 %673  ;;  %v1086_v3 = vmul.u32 14564, %v1083_v50  ;;  %v1088_v4 = vmul.u32 14564, %v1084_v55 }
  0xb4   : > { %v587_v7 = vsel %vm584_vm5, %v581_v61, %v583_v5  ;;  %v679_v8 = vsel %vm677_vm6, %v672_v63, %v674_v6  ;;  %1310 = vmatmul.msk.f32.vlgmr.msrb.gmra.mxu0 %vm235_vm1, %v1308_v2  ;;  %v1117_v61 = vmul.u32 14564, %v1113_v51  ;;  %v1090_v5 = vshll.u32 %v1087_v56, 16 }
  0xb5   : > { %1313 = vmatpush.msk.msrb.mxu2 %vm239_vm0, %v587_v7  ;;  %1318 = vmatpush.msk.msra.mxu0 %vm239_vm0, %v679_v8  ;;  %v1063_v7 = vshll.u32 %v1059_v0, 16 }
  0xb6   : > { %1312 = vmatmul.msk.f32.vlgmr.msrb.gmra.mxu1 %vm235_vm1, %v1308_v2  ;;  %1314 = vmatmul.msk.f32.vlgmr.msrb.gmra.mxu2 %vm235_vm1, %v1308_v2  ;;  %vm1094_vm12 = vc.u32 %v1086_v3, %v1090_v5 }
  0xb9   : > { %v676_v9 = vpop.permute.xlu0 %675 }
  0xba   : > { %v680_v11 = vsel %vm677_vm6, %v674_v6, %v676_v9  ;;  %v1121_v6 = vshll.u32 %v1117_v61, 16  ;;  %v1125_v9 = vadd.s32 %v1119_v62, %v1115_v60 }
  0xbb   : > { %v670_v12 = vpop.permute.xlu1 %669  ;;  %v858_v13 = vpop.permute.xlu2 %857  ;;  %1320 = vmatpush.msk.msra.mxu1 %vm239_vm0, %v680_v11  ;;  %v1096_v11 = vadd.s32 %v1090_v5, %v1086_v3 }
  0xbc   : > { %v678_v14 = vsel %vm677_vm6, %v670_v12, %v672_v63  ;;  %1319 = vmatmul.msk.f32.vlgmr.msra.gmra.mxu0 %vm235_vm1, %v1315_v10  ;;  %v1057_v63 = vmul.u32 14564, %v1054_v49  ;;  %v1118_v12 = vmul.u32 58254, %v1113_v51  ;;  %vm1127_vm14 = vc.u32 %v1125_v9, %v1121_v6 }
  0xbd   : > { %1316 = vmatpush.msk.msrb.mxu3 %vm239_vm0, %v678_v14  ;;  %v1124_v14 = vsel %vm1123_vm10, 1, %v1382_v23  ;;  %v1093_v49 = vshrl.u32 %v1088_v4, 16 }
  0xbe   : > { %1317 = vmatmul.msk.f32.vlgmr.msrb.gmra.mxu3 %vm235_vm1, %v1315_v10  ;;  %1321 = vmatmul.msk.f32.vlgmr.msra.gmra.mxu1 %vm235_vm1, %v1315_v10  ;;  %vm1065_vm11 = vc.u32 %v1057_v63, %v1061_v1  ;;  %v1067_v8 = vadd.s32 %v1061_v1, %v1057_v63  ;;  %v1092_v10 = vshll.u32 %v1088_v4, 16 }
  0xc0   : > { %vm1069_vm13 = vc.u32 %v1067_v8, %v1063_v7  ;;  %vm1098_vm15 = vc.u32 %v1096_v11, %v1092_v10 }
  0xc1   : > { %v763_v15 = vpop.permute.xlu0 %762 }
  0xc3   : > { %v765_v16 = vpop.permute.xlu1 %764  ;;  %v856_v18 = vpop.permute.xlu2 %855 }
  0xc4   : > { %v771_v20 = vsel %vm770_vm7, %v763_v15, %v765_v16  ;;  %v864_v21 = vsel %vm863_vm8, %v856_v18, %v858_v13  ;;  %v1066_v15 = vsel %vm1065_vm11, 1, %v1382_v23  ;;  %v1095_v18 = vsel %vm1094_vm12, 1, %v1382_v23 }
  0xc5   : > { %1323 = vmatpush.msk.msra.mxu2 %vm239_vm0, %v771_v20  ;;  %1330 = vmatpush.msk.msrb.mxu1 %vm239_vm0, %v864_v21  ;;  %v1126_v21 = vadd.s32 %v1124_v14, %v1118_v12 }
  0xc6   : > { %1324 = vmatmul.msk.f32.vlgmr.msra.gmra.mxu2 %vm235_vm1, %v1322_v17  ;;  %1331 = vmatmul.msk.f32.vlgmr.msrb.gmra.mxu1 %vm235_vm1, %v1329_v19 }
  0xc9   : > { %v860_v24 = vpop.permute.xlu0 %859 }
  0xca   : > { %v865_v25 = vsel %vm863_vm8, %v858_v13, %v860_v24  ;;  %v1060_v13 = vmul.u32 58254, %v1055_v53 }
  0xcb   : > { %v767_v26 = vpop.permute.xlu1 %766  ;;  %1332 = vmatpush.msk.msrb.mxu2 %vm239_vm0, %v865_v25  ;;  %v955_v32 = vpop.permute.xlu2 %954 }
  0xcc   : > { %v772_v27 = vsel %vm770_vm7, %v765_v16, %v767_v26  ;;  %v1089_v16 = vmul.u32 58254, %v1084_v55  ;;  %v1068_v22 = vadd.s32 %v1066_v15, %v1060_v13 }
  0xcd   : > { %1325 = vmatpush.msk.msra.mxu3 %vm239_vm0, %v772_v27 }
  0xce   : > { %1326 = vmatmul.msk.f32.vlgmr.msra.gmra.mxu3 %vm235_vm1, %v1322_v17  ;;  %1333 = vmatmul.msk.f32.vlgmr.msrb.gmra.mxu2 %vm235_vm1, %v1329_v19  ;;  %v1097_v27 = vadd.s32 %v1095_v18, %v1089_v16 }
  0xd1   : > { %v862_v28 = vpop.permute.xlu0 %861 }
  0xd2   : > { %v866_v29 = vsel %vm863_vm8, %v860_v24, %v862_v28  ;;  %v1128_v24 = vsel %vm1127_vm14, 1, %v1382_v23  ;;  %v1099_v28 = vsel %vm1098_vm15, 1, %v1382_v23  ;;  %vm1182_vm14 = vcmask 7168  }
  0xd3   : > { %v769_v30 = vpop.permute.xlu1 %768  ;;  %1334 = vmatpush.msk.msrb.mxu3 %vm239_vm0, %v866_v29  ;;  %v1120_v29 = vshrl.u32 %v1116_v52, 16  ;;  %vm1184_vm15 = vcmask 15360  }
  0xd4   : > { %v773_v31 = vsel %vm770_vm7, %v767_v26, %v769_v30  ;;  %v1070_v26 = vsel %vm1069_vm13, 1, %v1382_v23  ;;  %v1130_v30 = vadd.s32 %v1128_v24, %v1126_v21 }
  0xd5   : > { %1327 = vmatpush.msk.msrb.mxu0 %vm239_vm0, %v773_v31  ;;  %v1062_v31 = vshrl.u32 %v1058_v54, 16 }
  0xd6   : > { %1328 = vmatmul.msk.f32.vlgmr.msrb.gmra.mxu0 %vm235_vm1, %v1322_v17  ;;  %1335 = vmatmul.msk.f32.vlgmr.msrb.gmra.mxu3 %vm235_vm1, %v1329_v19 }
  0xd9   : > { %v949_v36 = vpop.permute.xlu0 %948 }
  0xdb   : > { %v953_v33 = vpop.permute.xlu1 %952 }
  0xdc   : > { %v959_v35 = vsel %vm956_vm9, %v953_v33, %v955_v32  ;;  %v1072_v32 = vadd.s32 %v1070_v26, %v1068_v22 }
  0xdd   : > { %1341 = vmatpush.msk.msra.mxu2 %vm239_vm0, %v959_v35  ;;  %v1122_v35 = vshrl.u32 %v1117_v61, 16 }
  0xde   : > { %1342 = vmatmul.msk.f32.vlgmr.msra.gmra.mxu2 %vm235_vm1, %v1336_v34 }
  0xe3   : > { %v951_v37 = vpop.permute.xlu1 %950 }
  0xe4   : > { %v958_v38 = vsel %vm956_vm9, %v951_v37, %v953_v33  ;;  %v957_v39 = vsel %vm956_vm9, %v949_v36, %v951_v37  ;;  %v1091_v33 = vshrl.u32 %v1087_v56, 16  ;;  %v1131_v36 = vadd.s32 %v1130_v30, %v1120_v29 }
  0xe5   : > { %1337 = vmatpush.msk.msra.mxu0 %vm239_vm0, %v957_v39  ;;  %1339 = vmatpush.msk.msra.mxu1 %vm239_vm0, %v958_v38  ;;  %v1064_v38 = vshrl.u32 %v1059_v0, 16  ;;  %v1073_v39 = vadd.s32 %v1072_v32, %v1062_v31  ;;  %vm1158_vm9 = vcmp.lt.s32.totalorder %v1563_v45, 288 }
  0xe6   : > { %1338 = vmatmul.msk.f32.vlgmr.msra.gmra.mxu0 %vm235_vm1, %v1336_v34  ;;  %1340 = vmatmul.msk.f32.vlgmr.msra.gmra.mxu1 %vm235_vm1, %v1336_v34  ;;  %v1101_v34 = vadd.s32 %v1099_v28, %v1097_v27  ;;  %v1132_v55 = vadd.s32 %v1131_v36, %v1122_v35  ;;  %v1036_v28 = vpop.permute.xlu2 %1035 }
  0xe7   : > { %v1074_v52 = vadd.s32 %v1073_v39, %v1064_v38 }
  0xe8   : > { %v1102_v50 = vadd.s32 %v1101_v34, %v1091_v33  ;;  %v1133_v61 = vshrl.u32 %v1132_v55, 4 }
  0xe9   : > { %v1075_v63 = vshrl.u32 %v1074_v52, 4 }
  0xea   : > { %v1103_v54 = vadd.s32 %v1102_v50, %v1093_v49  ;;  %v1134_v6 = vmul.u32 18, %v1133_v61 }
  0xec   : > { %v1104_v1 = vshrl.u32 %v1103_v54, 4 }
 0x112   : > { %v1554_v41 = vpop.f32.mrf.mxu0 }
 0x113   : > { %v339_v56 = vadd.f32 %v1565_v46, %v1554_v41  ;;  %v1135_v41 = vsub.s32 %v1563_v45, %v1134_v6 }
 0x114   : > { %v1558_v43 = vpop.f32.mrf.mxu1 }
 0x115   : > { %vm1140_vm0 = vcmp.ne.s32.totalorder %v1135_v41, 0  ;;  %vm1143_vm1 = vcmp.lt.s32.totalorder %v1135_v41, 0  ;;  %v1149_v18 = vadd.s32 18, %v1135_v41 }
 0x116   : > { %vm1592_vm6 = vmand %vm1143_vm1, %vm1140_vm0 }
 0x117   : > { %v1152_v29 = vsel %vm1592_vm6, %v1149_v18, %v1135_v41 }
 0x118   : > { %vm1155_vm10 = vcmp.lt.s32.totalorder %v1152_v29, 16 }
 0x119   : > { %v1560_v44 = vpop.f32.mrf.mxu2  ;;  %vm1161_vm13 = vmand %vm1155_vm10, %vm1158_vm9 }
 0x11a   : > { %v358_v57 = vpop.f32.mrf.mxu0 }
 0x11b   : > { %v359_v51 = vadd.f32 %v358_v57, %v1558_v43 }
 0x11c   : > { %v378_v58 = vpop.f32.mrf.mxu1 }
 0x11d   : > { %v379_v23 = vadd.f32 %v378_v58, %v1560_v44  ;;  %v1076_v44 = vmul.u32 18, %v1075_v63  ;;  %v1105_v58 = vmul.u32 18, %v1104_v1 }
 0x11f   : > { %v448_v2 = vpop.f32.mrf.mxu3  ;;  %v1106_v11 = vsub.s32 %v1569_v48, %v1105_v58 }
 0x120   : > { %v472_v60 = vadd.f32 %v448_v2, %v359_v51  ;;  %v1077_v2 = vsub.s32 %v1556_v42, %v1076_v44 }
 0x121   : > { %v1576_v59 = vpop.f32.mrf.mxu2  ;;  %vm1139_vm4 = vcmp.ne.s32.totalorder %v1106_v11, 0  ;;  %vm1142_vm5 = vcmp.lt.s32.totalorder %v1106_v11, 0  ;;  %v1148_v24 = vadd.s32 18, %v1106_v11 }
 0x122   : > { %v468_v17 = vpop.f32.mrf.mxu0  ;;  %v471_v3 = vadd.f32 %v1576_v59, %v339_v56  ;;  %vm1138_vm2 = vcmp.ne.s32.totalorder %v1077_v2, 0  ;;  %vm1141_vm3 = vcmp.lt.s32.totalorder %v1077_v2, 0  ;;  %v1147_v22 = vadd.s32 18, %v1077_v2  ;;  %vm1600_vm8 = vmand %vm1142_vm5, %vm1139_vm4 }
 0x123   : > { %v473_v62 = vadd.f32 %v468_v17, %v379_v23  ;;  %vm1596_vm7 = vmand %vm1141_vm3, %vm1138_vm2  ;;  %v1151_v36 = vsel %vm1600_vm8, %v1148_v24, %v1106_v11 }
 0x124   : > { %v1150_v35 = vsel %vm1596_vm7, %v1147_v22, %v1077_v2  ;;  %vm1154_vm12 = vcmp.lt.s32.totalorder %v1151_v36, 16 }
 0x125   : > { %vm1153_vm11 = vcmp.lt.s32.totalorder %v1150_v35, 16 }
 0x127   : > { %v561_v25 = vpop.f32.mrf.mxu3 }
 0x128   : > { %v566_v7 = vadd.f32 %v561_v25, %v473_v62 }
 0x129   : > { %v541_v20 = vpop.f32.mrf.mxu2 }
 0x12a   : > { %v565_v5 = vadd.f32 %v541_v20, %v472_v60 }
 0x12b   : > { %v521_v19 = vpop.f32.mrf.mxu1 }
 0x12c   : > { %v564_v8 = vadd.f32 %v521_v19, %v471_v3 }
 0x131   : > { %v614_v37 = vpop.f32.mrf.mxu0 }
 0x132   : > { %v657_v12 = vadd.f32 %v614_v37, %v564_v8 }
 0x133   : > { %v634_v40 = vpop.f32.mrf.mxu1 }
 0x134   : > { %v658_v9 = vadd.f32 %v634_v40, %v565_v5 }
 0x139   : > { %v654_v47 = vpop.f32.mrf.mxu2  ;;  %v727_v4 = vpop.f32.mrf.mxu0 }
 0x13a   : > { %v659_v46 = vadd.f32 %v654_v47, %v566_v7  ;;  %v751_v59 = vadd.f32 %v727_v4, %v658_v9 }
 0x13b   : > { %v747_v43 = vpop.f32.mrf.mxu1 }
 0x13c   : > { %v752_v16 = vadd.f32 %v747_v43, %v659_v46 }
 0x141   : > { %v707_v53 = vpop.f32.mrf.mxu3 }
 0x142   : > { %v750_v15 = vadd.f32 %v707_v53, %v657_v12 }
 0x143   : > { %v893_v13 = vpop.f32.mrf.mxu1 }
 0x149   : > { %v800_v0 = vpop.f32.mrf.mxu2 }
 0x14a   : > { %v843_v19 = vadd.f32 %v800_v0, %v750_v15 }
 0x14c   : > { %v936_v30 = vadd.f32 %v893_v13, %v843_v19 }
 0x151   : > { %v820_v57 = vpop.f32.mrf.mxu3  ;;  %v913_v10 = vpop.f32.mrf.mxu2 }
 0x152   : > { %v844_v42 = vadd.f32 %v820_v57, %v751_v59 }
 0x153   : > { %v840_v14 = vpop.f32.mrf.mxu0 }
 0x154   : > { %v845_v20 = vadd.f32 %v840_v14, %v752_v16  ;;  %v937_v31 = vadd.f32 %v913_v10, %v844_v42 }
 0x159   : > { %v933_v17 = vpop.f32.mrf.mxu3 }
 0x15a   : > { %v938_v25 = vadd.f32 %v933_v17, %v845_v20 }
 0x161   : > { %v1026_v27 = vpop.f32.mrf.mxu2 }
 0x162   : > { %v1031_v32 = vadd.f32 %v1026_v27, %v938_v25 }
 0x163   : > { %v986_v33 = vpop.f32.mrf.mxu0  ;;  %v1006_v34 = vpop.f32.mrf.mxu1 }
 0x164   : > { %v1040_v37 = vadd.f32 %v1036_v28, %v1031_v32  ;;  %v1029_v38 = vadd.f32 %v986_v33, %v936_v30  ;;  %v1030_v39 = vadd.f32 %v1006_v34, %v937_v31 }
 0x166   : > { %v1043_v40 = vmax.f32 %v1040_v37, 0.0  ;;  %v1038_v47 = vadd.f32 %v1036_v28, %v1029_v38  ;;  %v1039_v49 = vadd.f32 %v1036_v28, %v1030_v39 }
 0x168   : > { %1046 = vst [vmem:[%s204_s28 + $0x10] sm:$0xff] %v1043_v40  ;;  %v1041_v50 = vmax.f32 %v1038_v47, 0.0  ;;  %v1042_v51 = vmax.f32 %v1039_v49, 0.0  ;;  %v1170_v55 = vsel %vm1161_vm13, %v1043_v40, 0.0 }
 0x169   : > { %v1177_v60 = vmul.f32 %v1170_v55, %v1170_v55 }
 0x16a   : > { %1044 = vst [vmem:[%s204_s28] sm:$0xff] %v1041_v50  ;;  %v1168_v45 = vsel %vm1153_vm11, %v1041_v50, 0.0  ;;  %v1169_v53 = vsel %vm1154_vm12, %v1042_v51, 0.0 }
 0x16b   : > { %1045 = vst [vmem:[%s204_s28 + $0x8] sm:$0xff] %v1042_v51  ;;  %v1171_v23 = vadd.f32 %v1169_v53, %v1168_v45  ;;  %v1175_v52 = vmul.f32 %v1168_v45, %v1168_v45  ;;  %v1176_v54 = vmul.f32 %v1169_v53, %v1169_v53 }
 0x16d   : > { %v1172_v56 = vadd.f32 %v1171_v23, %v1170_v55  ;;  %v1178_v61 = vadd.f32 %v1176_v54, %v1175_v52 }
 0x16f   : > { %1173 = vadd.xlane.f32.xlu0 %v1172_v56  ;;  %v1179_v62 = vadd.f32 %v1178_v61, %v1177_v60 }
 0x171   : > { %1180 = vadd.xlane.f32.xlu1 %v1179_v62 }
 0x1e2   : > { %v1174_v63 = vpop.xlane.xlu0 %1173 }
 0x1e4   : > { %v1181_v0 = vpop.xlane.xlu1 %1180 }
 0x1e5   : > { %v1183_v1 = vsel %vm1182_vm14, %v1174_v63, %v1181_v0 }
 0x1e6   : > { %1185 = vst.msk [vmem:[%s208_s6] sm:$0xff] %vm1184_vm15, %v1183_v1 }
 0x1e7 PF: > { %s15_s15 = sadd.s32 1, %s1372_s15  }
 0x1e8   : > { %p12_p4 = scmp.ge.s32.totalorder %s15_s15, 4  }
 0x1ea   :  { %14 = sbr.rel (!%p12_p4) target bundleno = 1 (0x1), region = 91 }

</bundles_post_ra>
